<compile_context>
chip_gen: v7x
topology: tpu7x:2x2x1
jax: 0.10.0
libtpu: 0.0.40
codegen_flags: <defaults>
</compile_context>

<pallas_src>
import jax
import jax.numpy as jnp
from jax.experimental import pallas as pl
from jax.experimental.pallas import tpu as pltpu


def _make_f1_kernel(threshold, t_true, tile_t, need_col_mask):
    def kernel(preds_ref, targets_ref, mask_ref, out_ref, acc_ref):
        ci = pl.program_id(0)
        ki = pl.program_id(1)
        kk = pl.num_programs(1)

        @pl.when(ki == 0)
        def _init():
            for i in range(3):
                acc_ref[i] = jnp.int32(0)

        m = mask_ref[...]
        valid = m if m.dtype == jnp.bool_ else (m != 0)

        if need_col_mask:
            # Ragged tail / clamped over-provisioned steps: zero columns past T.
            start = (ci * kk + ki) * tile_t
            col = jax.lax.broadcasted_iota(jnp.int32, valid.shape, 1)
            valid = valid & (col < (t_true - start))

        pred_pos = preds_ref[...] > threshold   # native-dtype compare
        tgt_pos = targets_ref[...] > 0.5        # float {0,1} targets

        pp = valid & pred_pos                   # predicted positive (valid)
        tp = pp & tgt_pos                       # true positive
        tg = valid & tgt_pos                    # target positive (valid)

        # Per-step reduction to exact int32 scalars, accumulated in SMEM.
        acc_ref[0] += jnp.sum(tp.astype(jnp.int32))
        acc_ref[1] += jnp.sum(pp.astype(jnp.int32))
        acc_ref[2] += jnp.sum(tg.astype(jnp.int32))

        @pl.when(ki == kk - 1)
        def _fin():
            # One dense (1, 8, 128) store: row r (r < 3) broadcasts count r.
            row = jax.lax.broadcasted_iota(jnp.int32, (1, 8, 128), 1)
            blk = (jnp.where(row == 0, acc_ref[0], 0)
                   + jnp.where(row == 1, acc_ref[1], 0)
                   + jnp.where(row == 2, acc_ref[2], 0))
            out_ref[...] = blk

    return kernel


def f1_binary(preds, targets, mask, sample_weights=None, threshold=0.5,
              core_splits=2, target_step_bytes=8 << 20):
    """Pallas micro-F1 (binary). `sample_weights` intentionally unused (matches
    the reference PyTorch forward)."""
    del sample_weights
    b, t = preds.shape
    assert targets.shape == (b, t) and mask.shape == (b, t)

    itemsize_sum = (jnp.dtype(preds.dtype).itemsize
                    + jnp.dtype(targets.dtype).itemsize
                    + jnp.dtype(mask.dtype).itemsize)

    # Largest 128-multiple tile that keeps one step's total input traffic within
    # budget; never wider than the (128-rounded) row length.
    t128 = pl.cdiv(t, 128) * 128
    max_tile = max(128, (target_step_bytes // max(1, b * itemsize_sum)) // 128 * 128)
    tile_t = int(min(max_tile, t128))
    # TODO(synk): for very large B, additionally tile over the batch axis instead
    # of shrinking tile_t toward 128 (keeps the pipeline efficient and bounds VMEM).

    n_blocks = pl.cdiv(t, tile_t)
    c = max(1, min(core_splits, n_blocks))      # leading parallel axis (v7x: 2 TCs)
    kk = pl.cdiv(n_blocks, c)                   # reduction steps per core range
    need_col_mask = (t % tile_t != 0) or (c * kk != n_blocks)

    last_block = n_blocks - 1

    def in_map(ci, ki):
        # Clamp so over-provisioned (ci, ki) steps still read a valid block; their
        # contribution is zeroed by the in-kernel column-validity mask.
        return (0, jnp.minimum(ci * kk + ki, last_block))

    in_spec = pl.BlockSpec((b, tile_t), in_map)

    # Explicit VMEM budget: 3 inputs x 2 pipeline buffers + margin (fits v7x 64 MiB).
    step_bytes = b * tile_t * itemsize_sum
    vmem_limit = int(min(48 << 20, max(32 << 20, 2 * step_bytes + (8 << 20))))

    out = pl.pallas_call(
        _make_f1_kernel(float(threshold), t, tile_t, need_col_mask),
        out_shape=jax.ShapeDtypeStruct((c, 8, 128), jnp.int32),
        grid_spec=pltpu.PrefetchScalarGridSpec(
            num_scalar_prefetch=0,
            grid=(c, kk),
            in_specs=[in_spec, in_spec, in_spec],
            out_specs=pl.BlockSpec((1, 8, 128), lambda ci, ki: (ci, 0, 0)),
            scratch_shapes=[pltpu.SMEM((3,), jnp.int32)],
        ),
        compiler_params=pltpu.CompilerParams(
            dimension_semantics=("parallel", "arbitrary"),
            vmem_limit_bytes=vmem_limit,
        ),
    )(preds, targets, mask)

    # Combine per-core partial counts (exact int32) and form F1 in f32.
    counts = jnp.sum(out[:, 0:3, 0], axis=0)    # [TP, pred_pos, tgt_pos]
    tp = counts[0].astype(jnp.float32)
    fp = (counts[1] - counts[0]).astype(jnp.float32)
    fn = (counts[2] - counts[0]).astype(jnp.float32)
    denom = 2.0 * tp + fp + fn
    return jnp.where(denom > 0.0, 2.0 * tp / denom, jnp.float32(0.0))


def _ref_f1(preds, targets, mask, threshold=0.5):
    pp = preds > threshold
    tp = jnp.sum(mask & pp & (targets > 0.5))
    fp = jnp.sum(mask & pp & (targets <= 0.5))
    fn = jnp.sum(mask & ~pp & (targets > 0.5))
    denom = 2 * tp + fp + fn
    return jnp.where(denom > 0, 2.0 * tp / denom, 0.0)


if __name__ == "__main__":
    key = jax.random.PRNGKey(0)
    k1, k2, k3, k4, k5, k6 = jax.random.split(key, 6)

    # Case 1: small, aligned shapes (single block, fast path).
    B, T = 8, 256
    preds = jax.random.uniform(k1, (B, T), dtype=jnp.float32)              # probabilities
    targets = (jax.random.uniform(k2, (B, T)) > 0.5).astype(jnp.float32)   # {0,1}
    mask = jax.random.uniform(k3, (B, T)) > 0.2                            # bool [B, T]
    sample_weights = jnp.ones((B,), dtype=jnp.float32)                     # unused by forward

    f1 = f1_binary(preds, targets, mask, sample_weights, threshold=0.5)
    jax.block_until_ready(f1)
    ref = _ref_f1(preds, targets, mask)
    assert jnp.allclose(f1, ref, atol=1e-6), (f1, ref)

    # Case 2: ragged T, multiple blocks, 2-way core split + clamped tail path.
    B2, T2 = 4, 300
    preds2 = jax.random.uniform(k4, (B2, T2), dtype=jnp.float32)
    targets2 = (jax.random.uniform(k5, (B2, T2)) > 0.5).astype(jnp.float32)
    mask2 = jax.random.uniform(k6, (B2, T2)) > 0.3
    sw2 = jnp.ones((B2,), dtype=jnp.float32)

    # Tiny per-step budget to force tile_t=128 -> 3 blocks, c=2, ragged masking.
    f1b = f1_binary(preds2, targets2, mask2, sw2, threshold=0.5,
                    core_splits=2, target_step_bytes=B2 * 128 * 9)
    jax.block_until_ready(f1b)
    ref2 = _ref_f1(preds2, targets2, mask2)
    assert jnp.allclose(f1b, ref2, atol=1e-6), (f1b, ref2)

    print("KERNEL_OK")
</pallas_src>

<mosaic_0001>
module attributes {stable_mosaic.version = 11 : i64} {
  func.func @kernel(%arg0: i32, %arg1: i32, %arg2: memref<8x256xf32, #tpu.memory_space<vmem>>, %arg3: memref<8x256xf32, #tpu.memory_space<vmem>>, %arg4: memref<8x256xi32, #tpu.memory_space<vmem>>, %arg5: memref<1x8x128xi32, #tpu.memory_space<vmem>>, %arg6: memref<3xi32, #tpu.memory_space<smem>>) attributes {dimension_semantics = [#tpu.dimension_semantics<parallel>, #tpu.dimension_semantics<arbitrary>], iteration_bounds = array<i64: 1, 1>, scalar_prefetch = 0 : i64, scratch_operands = 1 : i64, tpu.core_type = #tpu.core_type<tc>, window_params = [{transform_indices = @transform_0, window_bounds = array<i64: 8, 256>}, {transform_indices = @transform_1, window_bounds = array<i64: 8, 256>}, {transform_indices = @transform_2, window_bounds = array<i64: 8, 256>}, {transform_indices = @transform_3, window_bounds = array<i64: 1, 8, 128>}]} {
    %c0_i32 = arith.constant 0 : i32
    %0 = arith.cmpi eq, %arg1, %c0_i32 : i32
    %1 = arith.extui %0 : i1 to i32
    %c0_i32_0 = arith.constant 0 : i32
    %2 = arith.cmpi ne, %1, %c0_i32_0 : i32
    scf.if %2 {
      %c0_i32_17 = arith.constant 0 : i32
      %c0_18 = arith.constant 0 : index
      %41 = memref.load %arg6[%c0_18] : memref<3xi32, #tpu.memory_space<smem>>
      memref.store %c0_i32_17, %arg6[%c0_18] : memref<3xi32, #tpu.memory_space<smem>>
      %c0_i32_19 = arith.constant 0 : i32
      %c1_20 = arith.constant 1 : index
      %42 = memref.load %arg6[%c1_20] : memref<3xi32, #tpu.memory_space<smem>>
      memref.store %c0_i32_19, %arg6[%c1_20] : memref<3xi32, #tpu.memory_space<smem>>
      %c0_i32_21 = arith.constant 0 : i32
      %c2_22 = arith.constant 2 : index
      %43 = memref.load %arg6[%c2_22] : memref<3xi32, #tpu.memory_space<smem>>
      memref.store %c0_i32_21, %arg6[%c2_22] : memref<3xi32, #tpu.memory_space<smem>>
    } else {
    }
    %c0 = arith.constant 0 : index
    %c0_1 = arith.constant 0 : index
    %3 = vector.load %arg4[%c0, %c0_1] : memref<8x256xi32, #tpu.memory_space<vmem>>, vector<8x256xi32>
    %cst = arith.constant dense<0> : vector<8x256xi32>
    %4 = arith.cmpi ne, %3, %cst : vector<8x256xi32>
    %c0_2 = arith.constant 0 : index
    %c0_3 = arith.constant 0 : index
    %5 = vector.load %arg2[%c0_2, %c0_3] : memref<8x256xf32, #tpu.memory_space<vmem>>, vector<8x256xf32>
    %cst_4 = arith.constant 5.000000e-01 : f32
    %6 = vector.broadcast %cst_4 : f32 to vector<8x256xf32>
    %7 = arith.cmpf ogt, %5, %6 : vector<8x256xf32>
    %c0_5 = arith.constant 0 : index
    %c0_6 = arith.constant 0 : index
    %8 = vector.load %arg3[%c0_5, %c0_6] : memref<8x256xf32, #tpu.memory_space<vmem>>, vector<8x256xf32>
    %cst_7 = arith.constant 5.000000e-01 : f32
    %9 = vector.broadcast %cst_7 : f32 to vector<8x256xf32>
    %10 = arith.cmpf ogt, %8, %9 : vector<8x256xf32>
    %11 = arith.andi %4, %7 : vector<8x256xi1>
    %12 = arith.andi %11, %10 : vector<8x256xi1>
    %13 = arith.andi %4, %10 : vector<8x256xi1>
    %c0_8 = arith.constant 0 : index
    %14 = memref.load %arg6[%c0_8] : memref<3xi32, #tpu.memory_space<smem>>
    %15 = arith.extui %12 : vector<8x256xi1> to vector<8x256xi32>
    %16 = vector.shape_cast %15 : vector<8x256xi32> to vector<1x8x256xi32>
    %cst_9 = arith.constant dense<0> : vector<1xi32>
    %17 = vector.multi_reduction <add>, %16, %cst_9 [1, 2] : vector<1x8x256xi32> to vector<1xi32>
    %18 = vector.shape_cast %17 : vector<1xi32> to vector<1x1x1xi32>
    %19 = vector.extract %18[0, 0, 0] : i32 from vector<1x1x1xi32>
    %20 = arith.addi %14, %19 : i32
    %c0_10 = arith.constant 0 : index
    %21 = memref.load %arg6[%c0_10] : memref<3xi32, #tpu.memory_space<smem>>
    memref.store %20, %arg6[%c0_10] : memref<3xi32, #tpu.memory_space<smem>>
    %c1 = arith.constant 1 : index
    %22 = memref.load %arg6[%c1] : memref<3xi32, #tpu.memory_space<smem>>
    %23 = arith.extui %11 : vector<8x256xi1> to vector<8x256xi32>
    %24 = vector.shape_cast %23 : vector<8x256xi32> to vector<1x8x256xi32>
    %cst_11 = arith.constant dense<0> : vector<1xi32>
    %25 = vector.multi_reduction <add>, %24, %cst_11 [1, 2] : vector<1x8x256xi32> to vector<1xi32>
    %26 = vector.shape_cast %25 : vector<1xi32> to vector<1x1x1xi32>
    %27 = vector.extract %26[0, 0, 0] : i32 from vector<1x1x1xi32>
    %28 = arith.addi %22, %27 : i32
    %c1_12 = arith.constant 1 : index
    %29 = memref.load %arg6[%c1_12] : memref<3xi32, #tpu.memory_space<smem>>
    memref.store %28, %arg6[%c1_12] : memref<3xi32, #tpu.memory_space<smem>>
    %c2 = arith.constant 2 : index
    %30 = memref.load %arg6[%c2] : memref<3xi32, #tpu.memory_space<smem>>
    %31 = arith.extui %13 : vector<8x256xi1> to vector<8x256xi32>
    %32 = vector.shape_cast %31 : vector<8x256xi32> to vector<1x8x256xi32>
    %cst_13 = arith.constant dense<0> : vector<1xi32>
    %33 = vector.multi_reduction <add>, %32, %cst_13 [1, 2] : vector<1x8x256xi32> to vector<1xi32>
    %34 = vector.shape_cast %33 : vector<1xi32> to vector<1x1x1xi32>
    %35 = vector.extract %34[0, 0, 0] : i32 from vector<1x1x1xi32>
    %36 = arith.addi %30, %35 : i32
    %c2_14 = arith.constant 2 : index
    %37 = memref.load %arg6[%c2_14] : memref<3xi32, #tpu.memory_space<smem>>
    memref.store %36, %arg6[%c2_14] : memref<3xi32, #tpu.memory_space<smem>>
    %c0_i32_15 = arith.constant 0 : i32
    %38 = arith.cmpi eq, %arg1, %c0_i32_15 : i32
    %39 = arith.extui %38 : i1 to i32
    %c0_i32_16 = arith.constant 0 : i32
    %40 = arith.cmpi ne, %39, %c0_i32_16 : i32
    scf.if %40 {
      %41 = tpu.iota {dimensions = array<i32: 1>} : vector<1x8x128xi32>
      %c0_i32_17 = arith.constant 0 : i32
      %42 = vector.broadcast %c0_i32_17 : i32 to vector<1x8x128xi32>
      %43 = arith.cmpi eq, %41, %42 : vector<1x8x128xi32>
      %c0_18 = arith.constant 0 : index
      %44 = memref.load %arg6[%c0_18] : memref<3xi32, #tpu.memory_space<smem>>
      %c0_i32_19 = arith.constant 0 : i32
      %45 = vector.broadcast %44 : i32 to vector<1x8x128xi32>
      %46 = vector.broadcast %c0_i32_19 : i32 to vector<1x8x128xi32>
      %47 = arith.select %43, %45, %46 : vector<1x8x128xi1>, vector<1x8x128xi32>
      %c1_i32 = arith.constant 1 : i32
      %48 = vector.broadcast %c1_i32 : i32 to vector<1x8x128xi32>
      %49 = arith.cmpi eq, %41, %48 : vector<1x8x128xi32>
      %c1_20 = arith.constant 1 : index
      %50 = memref.load %arg6[%c1_20] : memref<3xi32, #tpu.memory_space<smem>>
      %c0_i32_21 = arith.constant 0 : i32
      %51 = vector.broadcast %50 : i32 to vector<1x8x128xi32>
      %52 = vector.broadcast %c0_i32_21 : i32 to vector<1x8x128xi32>
      %53 = arith.select %49, %51, %52 : vector<1x8x128xi1>, vector<1x8x128xi32>
      %54 = arith.addi %47, %53 : vector<1x8x128xi32>
      %c2_i32 = arith.constant 2 : i32
      %55 = vector.broadcast %c2_i32 : i32 to vector<1x8x128xi32>
      %56 = arith.cmpi eq, %41, %55 : vector<1x8x128xi32>
      %c2_22 = arith.constant 2 : index
      %57 = memref.load %arg6[%c2_22] : memref<3xi32, #tpu.memory_space<smem>>
      %c0_i32_23 = arith.constant 0 : i32
      %58 = vector.broadcast %57 : i32 to vector<1x8x128xi32>
      %59 = vector.broadcast %c0_i32_23 : i32 to vector<1x8x128xi32>
      %60 = arith.select %56, %58, %59 : vector<1x8x128xi1>, vector<1x8x128xi32>
      %61 = arith.addi %54, %60 : vector<1x8x128xi32>
      %c0_24 = arith.constant 0 : index
      %c0_25 = arith.constant 0 : index
      %c0_26 = arith.constant 0 : index
      %62 = vector.load %arg5[%c0_24, %c0_25, %c0_26] : memref<1x8x128xi32, #tpu.memory_space<vmem>>, vector<1x8x128xi32>
      tpu.vector_store %arg5[%c0_24, %c0_25, %c0_26], %61 {strides = array<i32>} : memref<1x8x128xi32, #tpu.memory_space<vmem>>, vector<1x8x128xi32>,
    } else {
    }
    return
  }
  func.func @transform_0(%arg0: i32, %arg1: i32) -> (i32, i32) {
    %c1_i32 = arith.constant 1 : i32
    %0 = arith.muli %arg0, %c1_i32 : i32
    %1 = arith.addi %0, %arg1 : i32
    %c0_i32 = arith.constant 0 : i32
    %2 = arith.minsi %1, %c0_i32 : i32
    %c0_i32_0 = arith.constant 0 : i32
    %c0_i32_1 = arith.constant 0 : i32
    return %c0_i32_0, %2 : i32, i32
  }
  func.func @transform_1(%arg0: i32, %arg1: i32) -> (i32, i32) {
    %c1_i32 = arith.constant 1 : i32
    %0 = arith.muli %arg0, %c1_i32 : i32
    %1 = arith.addi %0, %arg1 : i32
    %c0_i32 = arith.constant 0 : i32
    %2 = arith.minsi %1, %c0_i32 : i32
    %c0_i32_0 = arith.constant 0 : i32
    %c0_i32_1 = arith.constant 0 : i32
    return %c0_i32_0, %2 : i32, i32
  }
  func.func @transform_2(%arg0: i32, %arg1: i32) -> (i32, i32) {
    %c1_i32 = arith.constant 1 : i32
    %0 = arith.muli %arg0, %c1_i32 : i32
    %1 = arith.addi %0, %arg1 : i32
    %c0_i32 = arith.constant 0 : i32
    %2 = arith.minsi %1, %c0_i32 : i32
    %c0_i32_0 = arith.constant 0 : i32
    %c0_i32_1 = arith.constant 0 : i32
    return %c0_i32_0, %2 : i32, i32
  }
  func.func @transform_3(%arg0: i32, %arg1: i32) -> (i32, i32, i32) {
    %c0_i32 = arith.constant 0 : i32
    %c0_i32_0 = arith.constant 0 : i32
    %c0_i32_1 = arith.constant 0 : i32
    return %arg0, %c0_i32, %c0_i32_0 : i32, i32, i32
  }
}

</mosaic_0001>

<bundles_post_ra>
// kernel: tpu_custom_call.1
= control target key start
LH: loop header
LB: loop body
LE: loop exit
PB: predicated region body
PF: predicated region fallthrough
CT: control target
= control target key end

     0   :  { %8 = vsyncpa [#allocation4], 0  ;;  %s382_s0 = inlined_call_operand.vmem [shape: f32[8,256], index: 0, kind: input, shape index: {}]   ;;  %s383_s1 = inlined_call_operand.hbm [shape: f32[8,256], index: 1, kind: input, shape index: {}]   ;;  %s384_s2 = inlined_call_operand.vmem [shape: s32[8,256], index: 2, kind: input, shape index: {}]   ;;  %s385_s3 = inlined_call_operand.hbm [shape: s32[1,8,128], index: 3, kind: output, shape index: {}]  }
   0x1   :  { %9 = vsyncpa [#allocation5], 0  ;;  %s317_s12 = smov [#allocation3]   ;;  %s269_s16 = scalar_lea.hbm %s383_s1, 256 }
   0x2   :  { %s36_s13 = sshll.u32 %s317_s12, 4  ;;  %p270_p0 = scmp.ne.s32.totalorder %s383_s1, %s269_s16  ;;  %s37_s13 = int_to_ptr.vmem [resolvable:$true] %s36_s13 }
   0x3   :  { %p273_p1 = scmp.lt.u32.totalorder %s269_s16, %s383_s1 }
   0x5   :  { %p275_p2 = pnand %p273_p1, %p270_p0 }
   0x7   :  { %278 = shalt.err (!%p275_p2)
}
   0x8   :  { %s279_s21 = scalar_lea.vmem %s37_s13, 256  ;;  %p284_p4 = scmp.lt.s32.totalorder %s37_s13, %s37_s13 }
   0x9   :  { %p280_p3 = scmp.ne.s32.totalorder %s37_s13, %s279_s21  ;;  %p285_p5 = scmp.lt.s32.totalorder %s279_s21, %s279_s21 }
   0xb   :  { %p286_p6 = por %p285_p5, %p284_p4 }
   0xd   :  { %p287_p7 = pnand %p286_p6, %p280_p3 }
   0xf   :  { %290 = shalt.err (!%p287_p7)
}
  0x10   :  { %39 = dma.hbm_to_vmem [thread:$0]  %s383_s1, 256, %s37_s13, [#allocation4]  }
  0x11   :  { %313 = dma.done.wait [#allocation4], 256  }
  0x12   :  { %314 = vsyncadd [#allocation4], 4294967040  ;;  %v111_v0 = vld [vmem:[%s384_s2] sm:$0xff]  ;;  %v112_v1 = vld [vmem:[%s384_s2 + $0x8] sm:$0xff]  ;;  %v318_v6 = vmov 0   ;;  %s319_s5 = smov [#allocation6]  }
  0x13   :  { %v115_v2 = vld [vmem:[%s382_s0] sm:$0xff]  ;;  %vm113_vm0 = vcmp.ne.s32.totalorder %v111_v0, 0  ;;  %vm114_vm1 = vcmp.ne.s32.totalorder %v112_v1, 0  ;;  %v116_v3 = vld [vmem:[%s382_s0 + $0x8] sm:$0xff]  ;;  %v210_v0 = vlaneseq  ;;  %s233_s6 = sshll.u32 %s319_s5, 4  ;;  %s234_s6 = int_to_ptr.vmem [resolvable:$true] %s233_s6 }
  0x14   :  { %vm117_vm2 = vcmp.gt.f32.partialorder %v115_v2, 0.5  ;;  %v119_v4 = vld [vmem:[#allocation3] sm:$0xff]  ;;  %v120_v5 = vld [vmem:[#allocation3 + $0x8] sm:$0xff]  ;;  %vm118_vm3 = vcmp.gt.f32.partialorder %v116_v3, 0.5  ;;  %s291_s7 = scalar_lea.vmem %s234_s6, 128  ;;  %p296_p9 = scmp.lt.s32.totalorder %s234_s6, %s234_s6 }
  0x15   :  { %vm121_vm4 = vcmp.gt.f32.partialorder %v119_v4, 0.5  ;;  %vm122_vm5 = vcmp.gt.f32.partialorder %v120_v5, 0.5  ;;  %vm123_vm6 = vmand %vm113_vm0, %vm117_vm2  ;;  %v211_v1 = vshrl.u32 %v210_v0, 7  ;;  %p292_p8 = scmp.ne.s32.totalorder %s234_s6, %s291_s7  ;;  %p297_p10 = scmp.lt.s32.totalorder %s291_s7, %s291_s7 }
  0x16   :  { %vm124_vm7 = vmand %vm114_vm1, %vm118_vm3  ;;  %v156_v7 = vsel %vm123_vm6, 1, %v318_v6 }
  0x17   :  { %vm126_vm8 = vmand %vm124_vm7, %vm122_vm5  ;;  %v157_v8 = vsel %vm124_vm7, 1, %v318_v6  ;;  %vm212_vm12 = vcmp.eq.s32.totalorder %v211_v1, 0  ;;  %vm216_vm13 = vcmp.eq.s32.totalorder %v211_v1, 1  ;;  %vm221_vm14 = vcmp.eq.s32.totalorder %v211_v1, 2  ;;  %p298_p11 = por %p297_p10, %p296_p9 }
  0x18   :  { %v158_v9 = vadd.s32 %v157_v8, %v156_v7  ;;  %vm125_vm9 = vmand %vm123_vm6, %vm121_vm4  ;;  %v131_v10 = vsel %vm126_vm8, 1, %v318_v6 }
  0x19   :  { %v130_v11 = vsel %vm125_vm9, 1, %v318_v6  ;;  %vm127_vm10 = vmand %vm113_vm0, %vm121_vm4  ;;  %p299_p12 = pnand %p298_p11, %p292_p8 }
  0x1a   :  { %v160_v12 = vshrl.u32 %v158_v9, 16  ;;  %v159_v13 = vand.u32 65535, %v158_v9  ;;  %v132_v14 = vadd.s32 %v131_v10, %v130_v11  ;;  %vm128_vm11 = vmand %vm114_vm1, %vm122_vm5  ;;  %v182_v15 = vsel %vm127_vm10, 1, %v318_v6 }
  0x1b   :  { %v183_v16 = vsel %vm128_vm11, 1, %v318_v6 }
  0x1c   :  { %v162_v17 = vcvt.s32.f32 %v160_v12  ;;  %v161_v18 = vcvt.s32.f32 %v159_v13  ;;  %v134_v19 = vshrl.u32 %v132_v14, 16  ;;  %v133_v20 = vand.u32 65535, %v132_v14 }
  0x1d   :  { %v184_v21 = vadd.s32 %v183_v16, %v182_v15 }
  0x1e   :  { %165 = vadd.xlane.f32.xlu0 %v162_v17  ;;  %163 = vadd.xlane.f32.xlu1 %v161_v18  ;;  %v136_v22 = vcvt.s32.f32 %v134_v19  ;;  %v135_v23 = vcvt.s32.f32 %v133_v20 }
  0x1f   :  { %v186_v24 = vshrl.u32 %v184_v21, 16  ;;  %v185_v25 = vand.u32 65535, %v184_v21 }
  0x21   :  { %v188_v26 = vcvt.s32.f32 %v186_v24  ;;  %v187_v27 = vcvt.s32.f32 %v185_v25 }
  0x22   :  { %139 = vadd.xlane.f32.xlu0 %v136_v22  ;;  %137 = vadd.xlane.f32.xlu1 %v135_v23 }
  0x26   :  { %191 = vadd.xlane.f32.xlu0 %v188_v26  ;;  %189 = vadd.xlane.f32.xlu1 %v187_v27 }
  0xab   :  { %v166_v28 = vpop.xlane.xlu0 %165  ;;  %v164_v29 = vpop.xlane.xlu1 %163 }
  0xac   :  { %v168_v30 = vcvt.f32.s32 %v166_v28  ;;  %v167_v31 = vcvt.f32.s32 %v164_v29 }
  0xae   :  { %v169_v32 = vshll.u32 %v168_v30, 16 }
  0xaf   :  { %v140_v33 = vpop.xlane.xlu0 %139  ;;  %v138_v34 = vpop.xlane.xlu1 %137 }
  0xb0   :  { %v170_v35 = vadd.s32 %v169_v32, %v167_v31  ;;  %v142_v36 = vcvt.f32.s32 %v140_v33  ;;  %v141_v37 = vcvt.f32.s32 %v138_v34 }
  0xb2   :  { %v171_v38 = vrot.slane %v170_v35, 4  ;;  %v143_v39 = vshll.u32 %v142_v36, 16 }
  0xb3   :  { %v192_v40 = vpop.xlane.xlu0 %191  ;;  %v190_v41 = vpop.xlane.xlu1 %189 }
  0xb4   :  { %v172_v42 = vadd.s32 %v171_v38, %v170_v35  ;;  %v144_v43 = vadd.s32 %v143_v39, %v141_v37  ;;  %v194_v44 = vcvt.f32.s32 %v192_v40  ;;  %v193_v45 = vcvt.f32.s32 %v190_v41 }
  0xb6   :  { %v145_v46 = vrot.slane %v144_v43, 4  ;;  %v195_v47 = vshll.u32 %v194_v44, 16  ;;  %v173_v48 = vrot.slane %v172_v42, 2 }
  0xb8   :  { %v196_v49 = vadd.s32 %v195_v47, %v193_v45  ;;  %v146_v50 = vadd.s32 %v145_v46, %v144_v43  ;;  %v174_v51 = vadd.s32 %v173_v48, %v172_v42 }
  0xba   :  { %v197_v52 = vrot.slane %v196_v49, 4  ;;  %v147_v53 = vrot.slane %v146_v50, 2  ;;  %v175_v56 = vrot.slane %v174_v51, 1 }
  0xbc   :  { %v198_v54 = vadd.s32 %v197_v52, %v196_v49  ;;  %v148_v55 = vadd.s32 %v147_v53, %v146_v50  ;;  %v176_v61 = vadd.s32 %v175_v56, %v174_v51 }
  0xbe   :  { %v149_v57 = vrot.slane %v148_v55, 1  ;;  %v199_v58 = vrot.slane %v198_v54, 2 }
  0xc0   :  { %v150_v59 = vadd.s32 %v149_v57, %v148_v55  ;;  %v200_v60 = vadd.s32 %v199_v58, %v198_v54 }
  0xc2   :  { %260 = vpush %v150_v59  ;;  %v201_v62 = vrot.slane %v200_v60, 1 }
  0xc3   :  { %262 = vpush %v176_v61 }
  0xc4   :  { %v202_v63 = vadd.s32 %v201_v62, %v200_v60 }
  0xc6   :  { %264 = vpush %v202_v63 }
  0xf3   :  { %s261_s0 = spop %260 }
  0xf4   :  { %v214_v2 = vstv %s261_s0  ;;  %s263_s1 = spop %262 }
  0xf5   :  { %v215_v3 = vsel %vm212_vm12, %v214_v2, 0  ;;  %v218_v4 = vstv %s263_s1 }
  0xf6   :  { %v219_v5 = vsel %vm216_vm13, %v218_v4, 0 }
  0xf7   :  { %s265_s2 = spop %264  ;;  %v220_v6 = vadd.s32 %v219_v5, %v215_v3 }
  0xf8   :  { %v223_v7 = vstv %s265_s2 }
  0xf9   :  { %v224_v8 = vsel %vm221_vm14, %v223_v7, 0 }
  0xfa   :  { %v225_v9 = vadd.s32 %v224_v8, %v220_v6 }
  0xfc   :  { %226 = vst [vmem:[#allocation6] sm:$0xff] %v225_v9 }
  0xfd   :  { %302 = shalt.err (!%p299_p12)
}
  0xfe   :  { %s303_s10 = scalar_lea.hbm %s385_s3, 128 }
  0xff   :  { %p304_p13 = scmp.ne.s32.totalorder %s385_s3, %s303_s10  ;;  %p307_p0 = scmp.lt.u32.totalorder %s303_s10, %s385_s3 }
 0x101   :  { %p309_p1 = pnand %p307_p0, %p304_p13 }
 0x103   :  { %312 = shalt.err (!%p309_p1)
}
 0x104   :  { %236 = dma.vmem_to_hbm [thread:$0]  %s234_s6, 128, %s385_s3, [#allocation5]  }
 0x105   :  { %315 = dma.done.wait [#allocation5], 128  }
 0x106   :  { %316 = vsyncadd [#allocation5], 4294967168 }
 0x107   :  { %240 = vsyncpa [#allocation4], 1 }
 0x108   :  { %241 = vsyncpa [#allocation5], 1 }

</bundles_post_ra>
